<compile_context>
chip_gen: v7x
topology: tpu7x:2x2x1
jax: 0.10.0
libtpu: 0.0.40
codegen_flags: <defaults>
</compile_context>

<pallas_src>
import functools

import jax
import jax.numpy as jnp
from jax.experimental import pallas as pl
from jax.experimental.pallas import tpu as pltpu


# --------------------------------------------------------------------------
# kernels
# --------------------------------------------------------------------------
def _conv1_kernel(a_ref, xw_ref, b_ref, w23_ref, o_ref, acc_ref):
    """K-tiled: acc += A[i,k] @ XW1[k];  epilogue: relu(acc+b1) @ W23 -> bf16."""
    k = pl.program_id(1)

    @pl.when(k == 0)
    def _():
        acc_ref[...] = jnp.zeros_like(acc_ref)

    acc_ref[...] += jnp.dot(a_ref[...], xw_ref[...],
                            preferred_element_type=jnp.float32)

    @pl.when(k == pl.num_programs(1) - 1)
    def _():
        h = jnp.maximum(acc_ref[...] + b_ref[...], 0.0)
        # dropout(p=0.5) -> identity in eval mode
        o_ref[...] = jnp.dot(h, w23_ref[...],
                             preferred_element_type=jnp.float32
                             ).astype(o_ref.dtype)


def _conv2_out_kernel(a_ref, hw_ref, b_ref, o_ref, acc_ref, *, num_classes):
    """K-tiled: acc += A[i,k] @ HW23[k];  epilogue: softmax(acc + b23)."""
    k = pl.program_id(1)

    @pl.when(k == 0)
    def _():
        acc_ref[...] = jnp.zeros_like(acc_ref)

    acc_ref[...] += jnp.dot(a_ref[...], hw_ref[...],
                            preferred_element_type=jnp.float32)

    @pl.when(k == pl.num_programs(1) - 1)
    def _():
        logits = acc_ref[...] + b_ref[...]
        # mask the zero-padded class lanes so they do not enter the softmax
        col = jax.lax.broadcasted_iota(jnp.int32, logits.shape, 1)
        logits = jnp.where(col < num_classes, logits, -1e30)
        m = jnp.max(logits, axis=1, keepdims=True)
        e = jnp.exp(logits - m)
        denom = jnp.sum(e, axis=1, keepdims=True)
        o_ref[...] = e / denom          # epilogue-only: exact division is cheap


# --------------------------------------------------------------------------
# helpers
# --------------------------------------------------------------------------
def _round_up(v, m):
    return (v + m - 1) // m * m


def _pad2(a, rows, cols):
    return jnp.pad(a, ((0, rows - a.shape[0]), (0, cols - a.shape[1])))


def _vmem_capacity_bytes():
    try:
        return int(pltpu.get_tpu_info().vmem_capacity_bytes)
    except Exception:
        return 64 * 1024 * 1024          # conservative: v7x per-TC VMEM


def _default_tile_rows():
    # v5e/v6e (128 MiB VMEM): bigger row tiles amortize per-step overhead.
    # v7x (64 MiB): 512 is plenty once the contraction is K-tiled.
    return 1024 if _vmem_capacity_bytes() > (96 << 20) else 512


def _vmem_limit_bytes(tm, tk, hp, cp):
    """Budget that actually covers the chosen tiles, capped per generation."""
    hc = max(hp, cp)
    need = (2 * tm * tk * 2        # streamed A tile (bf16, double-buffered)
            + 2 * tk * hc * 2      # streamed XW1 / HW23 K tile (bf16, x2)
            + 2 * hp * cp * 4      # resident W2@W3 (f32, 2 buffers)
            + 4 * hc * 4           # biases
            + 2 * tm * cp * 4      # output tile (f32, 2 buffers)
            + tm * hc * 4)         # f32 accumulator scratch
    cap = _vmem_capacity_bytes()
    return int(min(max(2 * need, 32 << 20), (cap * 3) // 4))


def build_norm_adj(edge_index, num_nodes):
    """Dense A_hat = D^{-1/2} (A + I) D^{-1/2}; A[dst, src] = 1 per edge."""
    src, dst = edge_index[0], edge_index[1]
    a = jnp.zeros((num_nodes, num_nodes), jnp.float32)
    a = a.at[dst, src].add(1.0)
    a = a + jnp.eye(num_nodes, dtype=jnp.float32)
    deg = a.sum(axis=1)
    dinv = jnp.where(deg > 0, 1.0 / jnp.sqrt(deg), 0.0)
    return dinv[:, None] * a * dinv[None, :]


# --------------------------------------------------------------------------
# forward
# --------------------------------------------------------------------------
def gcn_forward(x, edge_index, params, *, tile_rows=None, tile_k=128):
    """GCN forward (eval mode), two K-tiled pipelined passes over dense A_hat."""
    w1, b1, w2, b2, w3, b3 = params
    n = x.shape[0]
    hid = w1.shape[1]
    n_cls = w3.shape[1]

    hp = _round_up(hid, 128)                  # lane-dense hidden dim
    cp = _round_up(n_cls, 128)                # lane-dense class dim

    tk = _round_up(int(tile_k), 128)          # K tile (lane dim of A blocks)
    n_k_pad = _round_up(n, tk)                # contraction width (128-aligned)

    if tile_rows is None:
        tile_rows = _default_tile_rows()
    # tm: multiple of tk, >= tk, <= n_k_pad  (guarantees HW23 rows >= n_k_pad
    # and exact block divisibility everywhere)
    tm = min(_round_up(int(tile_rows), tk), n_k_pad)
    n_rows_pad = _round_up(n, tm)             # row padding (decoupled from K)

    # ---- glue (plain JAX): adjacency + small dense folds --------------------
    a_hat = build_norm_adj(edge_index, n)                          # [n, n] f32
    a_bf16 = _pad2(a_hat, n_rows_pad, n_k_pad).astype(jnp.bfloat16)

    xw1 = _pad2(x @ w1, n_k_pad, hp).astype(jnp.bfloat16)          # [K, hp]
    b1p = _pad2(b1, 1, hp).astype(jnp.float32)

    w23p = _pad2(w2 @ w3, hp, cp).astype(jnp.float32)              # folded lin
    b23p = _pad2(b2 @ w3 + b3, 1, cp).astype(jnp.float32)

    grid = (n_rows_pad // tm, n_k_pad // tk)
    cparams = pltpu.CompilerParams(
        dimension_semantics=("parallel", "arbitrary"),   # rows across TCs, K seq.
        vmem_limit_bytes=_vmem_limit_bytes(tm, tk, hp, cp),
    )

    # ---- pass 1: HW23 = relu(A_hat @ (X W1) + b1) @ (W2 W3)  (bf16) ---------
    hw23 = pl.pallas_call(
        _conv1_kernel,
        out_shape=jax.ShapeDtypeStruct((n_rows_pad, cp), jnp.bfloat16),
        grid=grid,
        in_specs=[
            pl.BlockSpec((tm, tk), lambda i, k: (i, k)),    # A row/K tile
            pl.BlockSpec((tk, hp), lambda i, k: (k, 0)),    # X@W1 K tile
            pl.BlockSpec((1, hp), lambda i, k: (0, 0)),     # b1
            pl.BlockSpec((hp, cp), lambda i, k: (0, 0)),    # folded W2@W3
        ],
        out_specs=pl.BlockSpec((tm, cp), lambda i, k: (i, 0)),
        scratch_shapes=[pltpu.VMEM((tm, hp), jnp.float32)],
        compiler_params=cparams,
    )(a_bf16, xw1, b1p, w23p)

    # ---- pass 2: softmax(A_hat @ HW23 + (b2 W3 + b3)) -----------------------
    out = pl.pallas_call(
        functools.partial(_conv2_out_kernel, num_classes=n_cls),
        out_shape=jax.ShapeDtypeStruct((n_rows_pad, cp), jnp.float32),
        grid=grid,
        in_specs=[
            pl.BlockSpec((tm, tk), lambda i, k: (i, k)),    # A row/K tile
            pl.BlockSpec((tk, cp), lambda i, k: (k, 0)),    # HW23 K tile
            pl.BlockSpec((1, cp), lambda i, k: (0, 0)),     # folded bias
        ],
        out_specs=pl.BlockSpec((tm, cp), lambda i, k: (i, 0)),
        scratch_shapes=[pltpu.VMEM((tm, cp), jnp.float32)],
        compiler_params=cparams,
    )(a_bf16, hw23, b23p)

    return out[:n, :n_cls]


def init_params(key, num_features, hidden_channels, num_classes):
    ks = jax.random.split(key, 6)
    w1 = 0.1 * jax.random.normal(ks[0], (num_features, hidden_channels), jnp.float32)
    b1 = 0.1 * jax.random.normal(ks[1], (1, hidden_channels), jnp.float32)
    w2 = 0.1 * jax.random.normal(ks[2], (hidden_channels, hidden_channels), jnp.float32)
    b2 = 0.1 * jax.random.normal(ks[3], (1, hidden_channels), jnp.float32)
    w3 = 0.1 * jax.random.normal(ks[4], (hidden_channels, num_classes), jnp.float32)
    b3 = 0.1 * jax.random.normal(ks[5], (1, num_classes), jnp.float32)
    return (w1, b1, w2, b2, w3, b3)


def _reference_forward(x, edge_index, params):
    """Pure-JAX f32 reference (eval mode) for correctness checking."""
    a = build_norm_adj(edge_index, x.shape[0])
    w1, b1, w2, b2, w3, b3 = params
    h = jnp.maximum(a @ (x @ w1) + b1, 0.0)
    h2 = a @ (h @ w2) + b2
    return jax.nn.softmax(h2 @ w3 + b3, axis=1)


if __name__ == "__main__":
    key = jax.random.PRNGKey(0)
    k_x, k_p = jax.random.split(key)

    num_nodes = 8
    num_features = 16
    hidden_channels = 32
    num_classes = 4

    # node features
    x = jax.random.normal(k_x, (num_nodes, num_features), jnp.float32)

    # undirected ring graph + a few chords, as (2, E) edge_index
    src = jnp.arange(num_nodes, dtype=jnp.int32)
    dst = (src + 1) % num_nodes
    chords_s = jnp.array([0, 2, 1, 5], dtype=jnp.int32)
    chords_d = jnp.array([4, 6, 3, 7], dtype=jnp.int32)
    s_all = jnp.concatenate([src, dst, chords_s, chords_d])
    d_all = jnp.concatenate([dst, src, chords_d, chords_s])
    edge_index = jnp.stack([s_all, d_all], axis=0)  # [2, 24]

    params = init_params(k_p, num_features, hidden_channels, num_classes)

    out = gcn_forward(x, edge_index, params)
    out = jax.block_until_ready(out)

    assert out.shape == (num_nodes, num_classes)
    # exact-division softmax epilogue -> rows sum to 1 at f32 precision
    assert bool(jnp.allclose(out.sum(axis=1), 1.0, atol=1e-3))
    # match the pure-JAX f32 reference (bf16 streaming -> loose tolerance)
    ref = _reference_forward(x, edge_index, params)
    assert bool(jnp.allclose(out, ref, atol=2e-2))
    print("KERNEL_OK")
</pallas_src>

<mosaic_0001>
module attributes {stable_mosaic.version = 11 : i64} {
  func.func @_conv1_kernel(%arg0: i32, %arg1: i32, %arg2: memref<128x128xbf16, #tpu.memory_space<vmem>>, %arg3: memref<128x128xbf16, #tpu.memory_space<vmem>>, %arg4: memref<1x128xf32, #tpu.memory_space<vmem>>, %arg5: memref<128x128xf32, #tpu.memory_space<vmem>>, %arg6: memref<128x128xbf16, #tpu.memory_space<vmem>>, %arg7: memref<128x128xf32, #tpu.memory_space<vmem>>) attributes {dimension_semantics = [#tpu.dimension_semantics<parallel>, #tpu.dimension_semantics<arbitrary>], iteration_bounds = array<i64: 1, 1>, scalar_prefetch = 0 : i64, scratch_operands = 1 : i64, tpu.core_type = #tpu.core_type<tc>, window_params = [{transform_indices = @transform_0, window_bounds = array<i64: 128, 128>}, {transform_indices = @transform_1, window_bounds = array<i64: 128, 128>}, {pipeline_mode = #tpu.pipeline_mode<synchronous>, transform_indices = @transform_2, window_bounds = array<i64: 1, 128>}, {pipeline_mode = #tpu.pipeline_mode<synchronous>, transform_indices = @transform_3, window_bounds = array<i64: 128, 128>}, {transform_indices = @transform_4, window_bounds = array<i64: 128, 128>}]} {
    %c0_i32 = arith.constant 0 : i32
    %0 = arith.cmpi eq, %arg1, %c0_i32 : i32
    %1 = arith.extui %0 : i1 to i32
    %c0_i32_0 = arith.constant 0 : i32
    %2 = arith.cmpi ne, %1, %c0_i32_0 : i32
    scf.if %2 {
      %cst_10 = arith.constant 0.000000e+00 : f32
      %12 = vector.broadcast %cst_10 : f32 to vector<128x128xf32>
      %c0_11 = arith.constant 0 : index
      %c0_12 = arith.constant 0 : index
      %13 = vector.load %arg7[%c0_11, %c0_12] : memref<128x128xf32, #tpu.memory_space<vmem>>, vector<128x128xf32>
      tpu.vector_store %arg7[%c0_11, %c0_12], %12 {strides = array<i32>} : memref<128x128xf32, #tpu.memory_space<vmem>>, vector<128x128xf32>,
    } else {
    }
    %c0 = arith.constant 0 : index
    %c0_1 = arith.constant 0 : index
    %3 = vector.load %arg7[%c0, %c0_1] : memref<128x128xf32, #tpu.memory_space<vmem>>, vector<128x128xf32>
    %c0_2 = arith.constant 0 : index
    %c0_3 = arith.constant 0 : index
    %4 = vector.load %arg2[%c0_2, %c0_3] : memref<128x128xbf16, #tpu.memory_space<vmem>>, vector<128x128xbf16>
    %c0_4 = arith.constant 0 : index
    %c0_5 = arith.constant 0 : index
    %5 = vector.load %arg3[%c0_4, %c0_5] : memref<128x128xbf16, #tpu.memory_space<vmem>>, vector<128x128xbf16>
    %cst = arith.constant dense<0.000000e+00> : vector<128x128xf32>
    %6 = tpu.matmul %4, %5, %cst {dimension_numbers = #tpu.dot_dimension_numbers<[1], [0], [0], [1], [0, 0, 1, 1], [], []>} : vector<128x128xbf16>, vector<128x128xbf16>, vector<128x128xf32> -> vector<128x128xf32>
    %7 = arith.addf %3, %6 : vector<128x128xf32>
    %c0_6 = arith.constant 0 : index
    %c0_7 = arith.constant 0 : index
    %8 = vector.load %arg7[%c0_6, %c0_7] : memref<128x128xf32, #tpu.memory_space<vmem>>, vector<128x128xf32>
    tpu.vector_store %arg7[%c0_6, %c0_7], %7 {strides = array<i32>} : memref<128x128xf32, #tpu.memory_space<vmem>>, vector<128x128xf32>,
    %c0_i32_8 = arith.constant 0 : i32
    %9 = arith.cmpi eq, %arg1, %c0_i32_8 : i32
    %10 = arith.extui %9 : i1 to i32
    %c0_i32_9 = arith.constant 0 : i32
    %11 = arith.cmpi ne, %10, %c0_i32_9 : i32
    scf.if %11 {
      %c0_10 = arith.constant 0 : index
      %c0_11 = arith.constant 0 : index
      %12 = vector.load %arg7[%c0_10, %c0_11] : memref<128x128xf32, #tpu.memory_space<vmem>>, vector<128x128xf32>
      %c0_12 = arith.constant 0 : index
      %c0_13 = arith.constant 0 : index
      %13 = vector.load %arg4[%c0_12, %c0_13] : memref<1x128xf32, #tpu.memory_space<vmem>>, vector<1x128xf32>
      %14 = vector.broadcast %13 : vector<1x128xf32> to vector<128x128xf32>
      %15 = arith.addf %12, %14 : vector<128x128xf32>
      %cst_14 = arith.constant 0.000000e+00 : f32
      %16 = vector.broadcast %cst_14 : f32 to vector<128x128xf32>
      %17 = arith.maximumf %15, %16 : vector<128x128xf32>
      %c0_15 = arith.constant 0 : index
      %c0_16 = arith.constant 0 : index
      %18 = vector.load %arg5[%c0_15, %c0_16] : memref<128x128xf32, #tpu.memory_space<vmem>>, vector<128x128xf32>
      %cst_17 = arith.constant dense<0.000000e+00> : vector<128x128xf32>
      %19 = tpu.matmul %17, %18, %cst_17 {dimension_numbers = #tpu.dot_dimension_numbers<[1], [0], [0], [1], [0, 0, 1, 1], [], []>} : vector<128x128xf32>, vector<128x128xf32>, vector<128x128xf32> -> vector<128x128xf32>
      %20 = arith.truncf %19 : vector<128x128xf32> to vector<128x128xbf16>
      %c0_18 = arith.constant 0 : index
      %c0_19 = arith.constant 0 : index
      %21 = vector.load %arg6[%c0_18, %c0_19] : memref<128x128xbf16, #tpu.memory_space<vmem>>, vector<128x128xbf16>
      tpu.vector_store %arg6[%c0_18, %c0_19], %20 {strides = array<i32>} : memref<128x128xbf16, #tpu.memory_space<vmem>>, vector<128x128xbf16>,
    } else {
    }
    return
  }
  func.func @transform_0(%arg0: i32, %arg1: i32) -> (i32, i32) {
    %c0_i32 = arith.constant 0 : i32
    return %arg0, %arg1 : i32, i32
  }
  func.func @transform_1(%arg0: i32, %arg1: i32) -> (i32, i32) {
    %c0_i32 = arith.constant 0 : i32
    %c0_i32_0 = arith.constant 0 : i32
    return %arg1, %c0_i32 : i32, i32
  }
  func.func @transform_2(%arg0: i32, %arg1: i32) -> (i32, i32) {
    %c0_i32 = arith.constant 0 : i32
    %c0_i32_0 = arith.constant 0 : i32
    %c0_i32_1 = arith.constant 0 : i32
    return %c0_i32, %c0_i32_0 : i32, i32
  }
  func.func @transform_3(%arg0: i32, %arg1: i32) -> (i32, i32) {
    %c0_i32 = arith.constant 0 : i32
    %c0_i32_0 = arith.constant 0 : i32
    %c0_i32_1 = arith.constant 0 : i32
    return %c0_i32, %c0_i32_0 : i32, i32
  }
  func.func @transform_4(%arg0: i32, %arg1: i32) -> (i32, i32) {
    %c0_i32 = arith.constant 0 : i32
    %c0_i32_0 = arith.constant 0 : i32
    return %arg0, %c0_i32 : i32, i32
  }
}

</mosaic_0001>

<bundles_post_ra>
// kernel: tpu_custom_call.1
= control target key start
LH: loop header
LB: loop body
LE: loop exit
PB: predicated region body
PF: predicated region fallthrough
CT: control target
= control target key end

     0   :  { %9 = vsyncpa [#allocation4], 0  ;;  %s1152_s0 = inlined_call_operand.hbm [shape: bf16[128,128], index: 0, kind: input, shape index: {}]   ;;  %s1153_s1 = inlined_call_operand.hbm [shape: bf16[128,128], index: 1, kind: input, shape index: {}]   ;;  %s1154_s2 = inlined_call_operand.vmem [shape: f32[1,128], index: 2, kind: input, shape index: {}]   ;;  %s1155_s3 = inlined_call_operand.hbm [shape: f32[128,128], index: 3, kind: input, shape index: {}]   ;;  %s1156_s4 = inlined_call_operand.hbm [shape: bf16[128,128], index: 4, kind: output, shape index: {}]  }
   0x1   :  { %10 = vsyncpa [#allocation7], 0 }
   0x2   :  { %11 = vsyncpa [#allocation5], 0  ;;  %s1052_s15 = smov [#allocation6]   ;;  %s1053_s17 = smov [#allocation3]  }
   0x3   :  { %s29_s16 = sshll.u32 %s1052_s15, 4  ;;  %s17_s18 = sshll.u32 %s1053_s17, 4  ;;  %s30_s16 = int_to_ptr.vmem [resolvable:$true] %s29_s16  ;;  %s1085_s18 = int_to_ptr.vmem [resolvable:$true] %s17_s18 }
   0x4   :  { %s958_s21 = scalar_lea.hbm %s1153_s1, 1024 }
   0x5   :  { %p959_p0 = scmp.ne.s32.totalorder %s1153_s1, %s958_s21  ;;  %p962_p1 = scmp.lt.u32.totalorder %s958_s21, %s1153_s1 }
   0x7   :  { %p964_p2 = pnand %p962_p1, %p959_p0 }
   0x9   :  { %967 = shalt.err (!%p964_p2)
}
   0xa   :  { %s968_s26 = scalar_lea.vmem %s30_s16, 1024  ;;  %p973_p4 = scmp.lt.s32.totalorder %s30_s16, %s30_s16 }
   0xb   :  { %p969_p3 = scmp.ne.s32.totalorder %s30_s16, %s968_s26  ;;  %p974_p5 = scmp.lt.s32.totalorder %s968_s26, %s968_s26 }
   0xd   :  { %p975_p6 = por %p974_p5, %p973_p4 }
   0xf   :  { %p976_p7 = pnand %p975_p6, %p969_p3 }
  0x11   :  { %979 = shalt.err (!%p976_p7)
}
  0x12   :  { %s1054_s27 = smov 64   ;;  %s1055_s28 = smov 4  }
  0x13   :  { %35 = dma.hbm_to_vmem [thread:$0]  %s1153_s1, 1024, %s30_s16, [#allocation7], %s1054_s27, %s1054_s27, %s1055_s28  }
  0x14   :  { %s980_s7 = scalar_lea.hbm %s1152_s0, 1024 }
  0x15   :  { %p981_p8 = scmp.ne.s32.totalorder %s1152_s0, %s980_s7  ;;  %p984_p9 = scmp.lt.u32.totalorder %s980_s7, %s1152_s0 }
  0x17   :  { %p986_p10 = pnand %p984_p9, %p981_p8 }
  0x19   :  { %989 = shalt.err (!%p986_p10)
}
  0x1a   :  { %s990_s12 = scalar_lea.vmem %s1085_s18, 1024  ;;  %p995_p12 = scmp.lt.s32.totalorder %s1085_s18, %s1085_s18 }
  0x1b   :  { %p991_p11 = scmp.ne.s32.totalorder %s1085_s18, %s990_s12  ;;  %p996_p13 = scmp.lt.s32.totalorder %s990_s12, %s990_s12 }
  0x1d   :  { %p997_p0 = por %p996_p13, %p995_p12 }
  0x1f   :  { %p998_p1 = pnand %p997_p0, %p991_p11 }
  0x21   :  { %1001 = shalt.err (!%p998_p1)
}
  0x22   :  { %23 = dma.hbm_to_vmem [thread:$0]  %s1152_s0, 1024, %s1085_s18, [#allocation4], %s1054_s27, %s1054_s27, %s1055_s28  }
  0x23   :  { %s1056_s14 = smov [#allocation8]   ;;  %s1002_s19 = scalar_lea.hbm %s1155_s3, 2048 }
  0x24   :  { %s43_s15 = sshll.u32 %s1056_s14, 4  ;;  %p1003_p2 = scmp.ne.s32.totalorder %s1155_s3, %s1002_s19  ;;  %s44_s15 = int_to_ptr.vmem [resolvable:$true] %s43_s15 }
  0x25   :  { %p1006_p3 = scmp.lt.u32.totalorder %s1002_s19, %s1155_s3 }
  0x27   :  { %p1008_p4 = pnand %p1006_p3, %p1003_p2 }
  0x29   :  { %1011 = shalt.err (!%p1008_p4)
}
  0x2a   :  { %s1012_s24 = scalar_lea.vmem %s44_s15, 2048  ;;  %p1017_p6 = scmp.lt.s32.totalorder %s44_s15, %s44_s15 }
  0x2b   :  { %p1013_p5 = scmp.ne.s32.totalorder %s44_s15, %s1012_s24  ;;  %p1018_p7 = scmp.lt.s32.totalorder %s1012_s24, %s1012_s24 }
  0x2d   :  { %p1019_p8 = por %p1018_p7, %p1017_p6 }
  0x2f   :  { %p1020_p9 = pnand %p1019_p8, %p1013_p5 }
  0x31   :  { %1023 = shalt.err (!%p1020_p9)
}
  0x32   :  { %s1057_s0 = smov 128   ;;  %s1058_s18 = smov 8  }
  0x33   :  { %49 = dma.hbm_to_vmem [thread:$0]  %s1155_s3, 2048, %s44_s15, [#allocation7], %s1057_s0, %s1057_s0, %s1058_s18  }
  0x34   :  { %1046 = dma.done.wait [#allocation4], 1024  }
  0x35   :  { %1047 = vsyncadd [#allocation4], 4294966272 }
  0x36   :  { %1048 = dma.done.wait [#allocation7], 3072  }
  0x37   :  { %1049 = vsyncadd [#allocation7], 4294964224  ;;  %v942_v0 = vld [vmem:[#allocation6] sm:$0xff]   ;;  %v943_v1 = vld [vmem:[#allocation6 + $0x8] sm:$0xff]  }
  0x38   :  { %814 = vmatprep.subr.bf16.mxu0 %v942_v0  ;;  %v944_v2 = vld [vmem:[#allocation6 + $0x10] sm:$0xff]   ;;  %v945_v3 = vld [vmem:[#allocation6 + $0x18] sm:$0xff]   ;;  %v950_v4 = vld [vmem:[#allocation3] sm:$0xff]  }
  0x39   :  { %815 = vmatpush3.bf16.msra.mxu0 %v942_v0  ;;  %830 = vmatprep.mubr.bf16.mxu0 %v950_v4  ;;  %v946_v5 = vld [vmem:[#allocation6 + $0x20] sm:$0xff]   ;;  %v947_v6 = vld [vmem:[#allocation6 + $0x28] sm:$0xff]   ;;  %v413_v9 = vld [vmem:[#allocation8 + $0x10] sm:$0xff] }
  0x3a   :  { %816 = vmatprep.subr.bf16.mxu0 %v943_v1  ;;  %v411_v7 = vld [vmem:[#allocation8] sm:$0xff]  ;;  %v412_v8 = vld [vmem:[#allocation8 + $0x8] sm:$0xff]  ;;  %v414_v11 = vld [vmem:[#allocation8 + $0x18] sm:$0xff] }
  0x3b   :  { %v902_v10 = vpack.c.bf16 %v412_v8, %v411_v7  ;;  %v906_v12 = vpack.c.bf16 %v414_v11, %v413_v9  ;;  %v415_v13 = vld [vmem:[#allocation8 + $0x20] sm:$0xff]  ;;  %v416_v14 = vld [vmem:[#allocation8 + $0x28] sm:$0xff]  ;;  %v948_v15 = vld [vmem:[#allocation6 + $0x30] sm:$0xff]  }
  0x3c   :  { %v910_v16 = vpack.c.bf16 %v416_v14, %v415_v13  ;;  %v417_v17 = vld [vmem:[#allocation8 + $0x30] sm:$0xff]  ;;  %v418_v18 = vld [vmem:[#allocation8 + $0x38] sm:$0xff]  ;;  %v419_v21 = vld [vmem:[#allocation8 + $0x40] sm:$0xff] }
  0x3d   :  { %817 = vmatpush3.bf16.msra.mxu0 %v943_v1  ;;  %903 = vmatprep.subr.bf16.mxu1 %v902_v10  ;;  %v949_v19 = vld [vmem:[#allocation6 + $0x38] sm:$0xff]   ;;  %v914_v20 = vpack.c.bf16 %v418_v18, %v417_v17  ;;  %v420_v22 = vld [vmem:[#allocation8 + $0x48] sm:$0xff]  ;;  %v421_v25 = vld [vmem:[#allocation8 + $0x50] sm:$0xff] }
  0x3e   :  { %818 = vmatprep.subr.bf16.mxu0 %v944_v2  ;;  %905 = vmatpush3.bf16.msra.mxu1 %v902_v10  ;;  %v918_v23 = vpack.c.bf16 %v420_v22, %v419_v21  ;;  %v951_v24 = vld [vmem:[#allocation3 + $0x8] sm:$0xff]   ;;  %v422_v26 = vld [vmem:[#allocation8 + $0x58] sm:$0xff]  ;;  %v952_v27 = vld [vmem:[#allocation3 + $0x10] sm:$0xff]  }
  0x3f   :  { %907 = vmatprep.subr.bf16.mxu1 %v906_v12  ;;  %v922_v28 = vpack.c.bf16 %v422_v26, %v421_v25  ;;  %v953_v29 = vld [vmem:[#allocation3 + $0x18] sm:$0xff]   ;;  %v954_v30 = vld [vmem:[#allocation3 + $0x20] sm:$0xff]   ;;  %v955_v31 = vld [vmem:[#allocation3 + $0x28] sm:$0xff]  }
  0x40   :  { %v956_v32 = vld [vmem:[#allocation3 + $0x30] sm:$0xff]   ;;  %v957_v33 = vld [vmem:[#allocation3 + $0x38] sm:$0xff]   ;;  %v423_v34 = vld [vmem:[#allocation8 + $0x60] sm:$0xff] }
  0x41   :  { %819 = vmatpush3.bf16.msra.mxu0 %v944_v2  ;;  %v424_v35 = vld [vmem:[#allocation8 + $0x68] sm:$0xff]  ;;  %v425_v37 = vld [vmem:[#allocation8 + $0x70] sm:$0xff]  ;;  %v426_v38 = vld [vmem:[#allocation8 + $0x78] sm:$0xff] }
  0x42   :  { %820 = vmatprep.subr.bf16.mxu0 %v945_v3  ;;  %909 = vmatpush3.bf16.msra.mxu1 %v906_v12  ;;  %v926_v36 = vpack.c.bf16 %v424_v35, %v423_v34  ;;  %v930_v39 = vpack.c.bf16 %v426_v38, %v425_v37  ;;  %v686_v40 = vld [vmem:[%s1154_s2] ss:$0 sm:$0xff]  ;;  %s1059_s2 = smov [#allocation9]  }
  0x43   :  { %911 = vmatprep.subr.bf16.mxu1 %v910_v16  ;;  %s657_s30 = sshll.u32 %s1059_s2, 4  ;;  %s658_s30 = int_to_ptr.vmem [resolvable:$true] %s657_s30 }
  0x44   :  { %s1024_s5 = scalar_lea.vmem %s658_s30, 1024  ;;  %p1029_p11 = scmp.lt.s32.totalorder %s658_s30, %s658_s30 }
  0x45   :  { %821 = vmatpush3.bf16.msra.mxu0 %v945_v3  ;;  %p1025_p10 = scmp.ne.s32.totalorder %s658_s30, %s1024_s5  ;;  %p1030_p12 = scmp.lt.s32.totalorder %s1024_s5, %s1024_s5 }
  0x46   :  { %822 = vmatprep.subr.bf16.mxu0 %v946_v5  ;;  %913 = vmatpush3.bf16.msra.mxu1 %v910_v16 }
  0x47   :  { %915 = vmatprep.subr.bf16.mxu1 %v914_v20  ;;  %p1031_p13 = por %p1030_p12, %p1029_p11 }
  0x49   :  { %823 = vmatpush3.bf16.msra.mxu0 %v946_v5  ;;  %p1032_p0 = pnand %p1031_p13, %p1025_p10 }
  0x4a   :  { %824 = vmatprep.subr.bf16.mxu0 %v947_v6  ;;  %917 = vmatpush3.bf16.msra.mxu1 %v914_v20 }
  0x4b   :  { %919 = vmatprep.subr.bf16.mxu1 %v918_v23 }
  0x4d   :  { %825 = vmatpush3.bf16.msra.mxu0 %v947_v6 }
  0x4e   :  { %826 = vmatprep.subr.bf16.mxu0 %v948_v15  ;;  %921 = vmatpush3.bf16.msra.mxu1 %v918_v23 }
  0x4f   :  { %923 = vmatprep.subr.bf16.mxu1 %v922_v28 }
  0x51   :  { %827 = vmatpush3.bf16.msra.mxu0 %v948_v15 }
  0x52   :  { %828 = vmatprep.subr.bf16.mxu0 %v949_v19  ;;  %925 = vmatpush3.bf16.msra.mxu1 %v922_v28 }
  0x53   :  { %927 = vmatprep.subr.bf16.mxu1 %v926_v36 }
  0x55   :  { %829 = vmatpush3.bf16.msra.mxu0 %v949_v19 }
  0x56   :  { %929 = vmatpush3.bf16.msra.mxu1 %v926_v36 }
  0x57   :  { %931 = vmatprep.subr.bf16.mxu1 %v930_v39 }
  0x58   :  { %831 = vmatmul.mubr.bf16.vlgmr.msra.gmra.mrb[0].mxu0 %v951_v24 }
  0x59   :  { %834 = vmatprep.mubr.bf16.mxu0 %v952_v27 }
  0x5a   :  { %933 = vmatpush3.bf16.msra.mxu1 %v930_v39 }
  0x60   :  { %835 = vmatmul.mubr.bf16.gmra.mrb[4].mxu0 %v953_v29 }
  0x61   :  { %838 = vmatprep.mubr.bf16.mxu0 %v954_v30 }
  0x68   :  { %839 = vmatmul.mubr.bf16.gmra.mrb[8].mxu0 %v955_v31 }
  0x69   :  { %842 = vmatprep.mubr.bf16.mxu0 %v956_v32 }
  0x70   :  { %843 = vmatmul.mubr.bf16.gmra.mrb[12].mxu0 %v957_v33 }
 0x12b   :  { %v832_v41 = vpop.f32.mrb[0].mxu0 }
 0x12c   :  { %v258_v42 = vpop.f32.mrb[1].mxu0  ;;  %v381_v45 = vadd.f32 %v832_v41, %v686_v40 }
 0x12d   :  { %v833_v43 = vpop.f32.mrb[2].mxu0  ;;  %v379_v44 = vadd.f32 %v686_v40, %v258_v42 }
 0x12e   :  { %v261_v46 = vpop.f32.mrb[3].mxu0  ;;  %v382_v49 = vadd.f32 %v833_v43, %v686_v40  ;;  %v397_v51 = vmax.f32 %v381_v45, 0.0 }
 0x12f   :  { %v380_v47 = vadd.f32 %v686_v40, %v261_v46  ;;  %v395_v48 = vmax.f32 %v379_v44, 0.0 }
 0x130   :  { %v398_v54 = vmax.f32 %v382_v49, 0.0 }
 0x131   :  { %v396_v50 = vmax.f32 %v380_v47, 0.0  ;;  %878 = vmatprep.mubr.f32.mxu1 %v395_v48 }
 0x133   :  { %v836_v52 = vpop.f32.mrb[4].mxu0  ;;  %879 = vmatmul.mubr.f32.vlgmr.msra.gmra.mrb[0].mxu1 %v396_v50 }
 0x134   :  { %v274_v53 = vpop.f32.mrb[5].mxu0  ;;  %881 = vmatprep.mubr.f32.mxu1 %v397_v51  ;;  %v385_v57 = vadd.f32 %v836_v52, %v686_v40 }
 0x135   :  { %v383_v55 = vadd.f32 %v686_v40, %v274_v53  ;;  %v837_v56 = vpop.f32.mrb[6].mxu0 }
 0x136   :  { %v277_v58 = vpop.f32.mrb[7].mxu0  ;;  %v386_v61 = vadd.f32 %v837_v56, %v686_v40  ;;  %v401_v63 = vmax.f32 %v385_v57, 0.0 }
 0x137   :  { %v399_v59 = vmax.f32 %v383_v55, 0.0  ;;  %v384_v60 = vadd.f32 %v686_v40, %v277_v58  ;;  %882 = vmatmul.mubr.f32.gmra.mrb[2].mxu1 %v398_v54 }
 0x138   :  { %v402_v2 = vmax.f32 %v386_v61, 0.0 }
 0x139   :  { %v400_v62 = vmax.f32 %v384_v60, 0.0  ;;  %884 = vmatprep.mubr.f32.mxu1 %v399_v59 }
 0x13b   :  { %v840_v0 = vpop.f32.mrb[8].mxu0  ;;  %885 = vmatmul.mubr.f32.gmra.mrb[4].mxu1 %v400_v62 }
 0x13c   :  { %v290_v1 = vpop.f32.mrb[9].mxu0  ;;  %887 = vmatprep.mubr.f32.mxu1 %v401_v63  ;;  %v389_v5 = vadd.f32 %v840_v0, %v686_v40 }
 0x13d   :  { %v387_v3 = vadd.f32 %v686_v40, %v290_v1  ;;  %v841_v4 = vpop.f32.mrb[10].mxu0 }
 0x13e   :  { %v293_v6 = vpop.f32.mrb[11].mxu0  ;;  %v390_v9 = vadd.f32 %v841_v4, %v686_v40  ;;  %v405_v11 = vmax.f32 %v389_v5, 0.0 }
 0x13f   :  { %v403_v7 = vmax.f32 %v387_v3, 0.0  ;;  %v388_v8 = vadd.f32 %v686_v40, %v293_v6  ;;  %888 = vmatmul.mubr.f32.gmra.mrb[6].mxu1 %v402_v2 }
 0x140   :  { %v406_v14 = vmax.f32 %v390_v9, 0.0 }
 0x141   :  { %v404_v10 = vmax.f32 %v388_v8, 0.0  ;;  %890 = vmatprep.mubr.f32.mxu1 %v403_v7 }
 0x143   :  { %v844_v12 = vpop.f32.mrb[12].mxu0  ;;  %891 = vmatmul.mubr.f32.gmra.mrb[8].mxu1 %v404_v10 }
 0x144   :  { %v306_v13 = vpop.f32.mrb[13].mxu0  ;;  %893 = vmatprep.mubr.f32.mxu1 %v405_v11  ;;  %v393_v17 = vadd.f32 %v844_v12, %v686_v40 }
 0x145   :  { %v391_v15 = vadd.f32 %v686_v40, %v306_v13  ;;  %v845_v16 = vpop.f32.mrb[14].mxu0 }
 0x146   :  { %v309_v18 = vpop.f32.mrb[15].mxu0  ;;  %v394_v21 = vadd.f32 %v845_v16, %v686_v40  ;;  %v409_v23 = vmax.f32 %v393_v17, 0.0 }
 0x147   :  { %v407_v19 = vmax.f32 %v391_v15, 0.0  ;;  %v392_v20 = vadd.f32 %v686_v40, %v309_v18  ;;  %894 = vmatmul.mubr.f32.gmra.mrb[10].mxu1 %v406_v14 }
 0x148   :  { %v410_v24 = vmax.f32 %v394_v21, 0.0 }
 0x149   :  { %v408_v22 = vmax.f32 %v392_v20, 0.0  ;;  %896 = vmatprep.mubr.f32.mxu1 %v407_v19 }
 0x14b   :  { %897 = vmatmul.mubr.f32.gmra.mrb[12].mxu1 %v408_v22 }
 0x14c   :  { %899 = vmatprep.mubr.f32.mxu1 %v409_v23 }
 0x14f   :  { %900 = vmatmul.mubr.f32.gmra.mrb[14].mxu1 %v410_v24 }
 0x206   :  { %v880_v25 = vpop.f32.mrb[0].mxu1 }
 0x207   :  { %v493_v26 = vpop.f32.mrb[1].mxu1 }
 0x208   :  { %v722_v27 = vpack.c.bf16 %v880_v25, %v493_v26 }
 0x20a   :  { %723 = vst [vmem:[#allocation9] sm:$0xff] %v722_v27   ;;  %v883_v28 = vpop.f32.mrb[2].mxu1 }
 0x20b   :  { %v503_v29 = vpop.f32.mrb[3].mxu1 }
 0x20c   :  { %v727_v30 = vpack.c.bf16 %v883_v28, %v503_v29 }
 0x20e   :  { %759 = vst [vmem:[#allocation9 + $0x8] sm:$0xff] %v727_v30   ;;  %v886_v31 = vpop.f32.mrb[4].mxu1 }
 0x20f   :  { %v513_v32 = vpop.f32.mrb[5].mxu1 }
 0x210   :  { %v732_v33 = vpack.c.bf16 %v886_v31, %v513_v32 }
 0x212   :  { %760 = vst [vmem:[#allocation9 + $0x10] sm:$0xff] %v732_v33   ;;  %v889_v34 = vpop.f32.mrb[6].mxu1 }
 0x213   :  { %v523_v35 = vpop.f32.mrb[7].mxu1 }
 0x214   :  { %v737_v36 = vpack.c.bf16 %v889_v34, %v523_v35 }
 0x216   :  { %761 = vst [vmem:[#allocation9 + $0x18] sm:$0xff] %v737_v36   ;;  %v892_v37 = vpop.f32.mrb[8].mxu1 }
 0x217   :  { %v533_v38 = vpop.f32.mrb[9].mxu1 }
 0x218   :  { %v742_v39 = vpack.c.bf16 %v892_v37, %v533_v38 }
 0x21a   :  { %762 = vst [vmem:[#allocation9 + $0x20] sm:$0xff] %v742_v39   ;;  %v895_v40 = vpop.f32.mrb[10].mxu1 }
 0x21b   :  { %v543_v41 = vpop.f32.mrb[11].mxu1 }
 0x21c   :  { %v747_v42 = vpack.c.bf16 %v895_v40, %v543_v41 }
 0x21e   :  { %763 = vst [vmem:[#allocation9 + $0x28] sm:$0xff] %v747_v42   ;;  %v898_v43 = vpop.f32.mrb[12].mxu1 }
 0x21f   :  { %v553_v44 = vpop.f32.mrb[13].mxu1 }
 0x220   :  { %v752_v45 = vpack.c.bf16 %v898_v43, %v553_v44 }
 0x222   :  { %764 = vst [vmem:[#allocation9 + $0x30] sm:$0xff] %v752_v45   ;;  %v901_v46 = vpop.f32.mrb[14].mxu1 }
 0x223   :  { %v563_v47 = vpop.f32.mrb[15].mxu1 }
 0x224   :  { %v757_v48 = vpack.c.bf16 %v901_v46, %v563_v47 }
 0x226   :  { %765 = vst [vmem:[#allocation9 + $0x38] sm:$0xff] %v757_v48  }
 0x227   :  { %1035 = shalt.err (!%p1032_p0)
}
 0x228   :  { %s1036_s8 = scalar_lea.hbm %s1156_s4, 1024 }
 0x229   :  { %p1037_p1 = scmp.ne.s32.totalorder %s1156_s4, %s1036_s8  ;;  %p1040_p2 = scmp.lt.u32.totalorder %s1036_s8, %s1156_s4 }
 0x22b   :  { %p1042_p3 = pnand %p1040_p2, %p1037_p1 }
 0x22d   :  { %1045 = shalt.err (!%p1042_p3)
}
 0x22e   :  { %663 = dma.vmem_to_hbm [thread:$0]  %s658_s30, 1024, %s1156_s4, [#allocation5], %s1054_s27, %s1054_s27, %s1055_s28  }
 0x22f   :  { %1050 = dma.done.wait [#allocation5], 1024  }
 0x230   :  { %1051 = vsyncadd [#allocation5], 4294966272 }
 0x231   :  { %667 = vsyncpa [#allocation4], 1 }
 0x232   :  { %668 = vsyncpa [#allocation7], 1 }
 0x233   :  { %669 = vsyncpa [#allocation5], 1 }

</bundles_post_ra>
